<compile_context>
chip_gen: v7x
topology: tpu7x:2x2x1
jax: 0.10.0
libtpu: 0.0.40
codegen_flags: <defaults>
</compile_context>

<pallas_src>
import functools

import jax
import jax.numpy as jnp
from jax.experimental import pallas as pl
from jax.experimental.pallas import tpu as pltpu

NUM_CLASSES = 10
GROUP = 64                      # original rows packed per dense row (= lcm(10,128)/10)
DENSE_C = GROUP * NUM_CLASSES   # 640 lanes = lcm(10, 128) -> lane-dense rows
MAX_TILE_ROWS = 4096            # dense rows per grid step (~20 MiB f32 x double-buffered)
ROW_ALIGN = 16                  # dense-row alignment (covers bf16 (16,128) sublane packing)


def _cdiv(a, b):
    return -(-a // b)


def _round_up(a, b):
    return _cdiv(a, b) * b


def _mse_loss_kernel(x_ref, lab_ref, sel_ref, out_ref):
    """One grid step: per-tile partial sums of (x - onehot)^2 over a (T, 640) lane-dense tile."""
    x = x_ref[...].astype(jnp.float32)        # (T, 640); in-kernel upcast (cheap VPU op)
    lab = lab_ref[...]                        # (T, 64) bf16; padded rows hold label -1

    # lab_rep[t, j] = lab[t, j // 10] via a bf16 selection matmul: single MXU pass, exact for
    # the small integers involved (-1..9 labels, 0/1 selector), hidden under the x DMA.
    lab_rep = jnp.dot(lab, sel_ref[...], preferred_element_type=jnp.float32)   # (T, 640) f32

    # Class pattern j % 10 built on-chip (no HBM stream / BlockSpec / double buffer for it).
    cls = (jax.lax.broadcasted_iota(jnp.int32, (1, DENSE_C), 1) % NUM_CLASSES
           ).astype(jnp.float32)
    one_hot = (lab_rep == cls).astype(jnp.float32)                             # (T, 640)

    diff = x - one_hot                        # padded rows: x == 0, one_hot == 0 -> 0
    # Per-lane partial sums: one sublane reduce per (large) tile, no cross-step carry, so the
    # grid axis is fully "parallel" (dual-TensorCore on v7x). Final reduce + sqrt in wrapper.
    out_ref[...] = jnp.sum(diff * diff, axis=0, keepdims=True)                 # (1, 640)


def _mse_loss_xla(inference, ground_truth):
    """Plain-JAX reference / small-batch fallback (identical semantics to the torch module)."""
    x = inference.astype(jnp.float32)
    ohe = jax.nn.one_hot(ground_truth, NUM_CLASSES, dtype=jnp.float32)
    return jnp.sqrt(jnp.sum((x - ohe) ** 2)) / x.shape[0]


@functools.partial(jax.jit, static_argnames=("min_pallas_batch",))
def mse_loss(inference, ground_truth, *, min_pallas_batch=32768):
    """inference: (B, 10) float (f32/bf16); ground_truth: (B,) int -> scalar f32 loss."""
    B, C = inference.shape
    assert C == NUM_CLASSES, f"expected {NUM_CLASSES} classes, got {C}"

    # Below the crossover, pallas_call dispatch/prologue dominates; let XLA fuse it instead.
    if B < min_pallas_batch:
        return _mse_loss_xla(inference, ground_truth)

    labels = ground_truth.astype(jnp.int32)

    # Pick a tile (multiple of 16 dense rows) that keeps padding small and DMAs amortized.
    dense_rows = _cdiv(B, GROUP)
    num_tiles = _cdiv(dense_rows, MAX_TILE_ROWS)
    tile_rows = _round_up(_cdiv(dense_rows, num_tiles), ROW_ALIGN)
    num_tiles = _cdiv(dense_rows, tile_rows)
    padded_dense_rows = num_tiles * tile_rows
    b_pad = padded_dense_rows * GROUP

    x = inference
    if b_pad != B:
        # Padded rows contribute exactly 0: x rows are zero and label -1 matches no class.
        x = jnp.pad(x, ((0, b_pad - B), (0, 0)))
        labels = jnp.pad(labels, (0, b_pad - B), constant_values=-1)

    # Row-major metadata reshape to the lane-dense view (no transpose, no data relayout).
    x_dense = x.reshape(padded_dense_rows, DENSE_C)                     # native dtype
    # bf16 labels: exact for -1..9, halve label HBM traffic, feed the bf16 MXU matmul directly.
    lab_dense = labels.reshape(padded_dense_rows, GROUP).astype(jnp.bfloat16)

    # Selection matrix (64, 640) in bf16 (0/1 exact); constant block index -> DMA'd once.
    lane = jnp.arange(DENSE_C, dtype=jnp.int32)
    sel = (lane[None, :] // NUM_CLASSES
           == jnp.arange(GROUP, dtype=jnp.int32)[:, None]).astype(jnp.bfloat16)

    partials = pl.pallas_call(
        _mse_loss_kernel,
        out_shape=jax.ShapeDtypeStruct((num_tiles, DENSE_C), jnp.float32),
        grid_spec=pltpu.PrefetchScalarGridSpec(
            num_scalar_prefetch=0,
            grid=(num_tiles,),
            in_specs=[
                pl.BlockSpec((tile_rows, DENSE_C), lambda i: (i, 0)),
                pl.BlockSpec((tile_rows, GROUP), lambda i: (i, 0)),
                pl.BlockSpec((GROUP, DENSE_C), lambda i: (0, 0)),
            ],
            out_specs=pl.BlockSpec((1, DENSE_C), lambda i: (i, 0)),
        ),
        compiler_params=pltpu.CompilerParams(
            dimension_semantics=("parallel",),       # per-tile partials -> v7x dual-TC capable
            vmem_limit_bytes=48 * 1024 * 1024,       # headroom on v7x (64 MiB/TC physical)
        ),
    )(x_dense, lab_dense, sel)

    # torch-module semantics: sqrt(sum((inference - onehot)^2)) / batch
    return jnp.sqrt(jnp.sum(partials)) / B


if __name__ == "__main__":
    key = jax.random.PRNGKey(0)
    k1, k2, k3, k4 = jax.random.split(key, 4)

    # Small shape from the spec (batch=2, num_classes=10); force the Pallas kernel path.
    B_small = 2
    inf_small = jax.random.normal(k1, (B_small, NUM_CLASSES), dtype=jnp.float32)
    gt_small = jax.random.randint(k2, (B_small,), 0, NUM_CLASSES, dtype=jnp.int32)

    loss_small = mse_loss(inf_small, gt_small, min_pallas_batch=0)   # exercise the kernel
    jax.block_until_ready(loss_small)
    ref_small = _mse_loss_xla(inf_small, gt_small)
    assert jnp.allclose(loss_small, ref_small, rtol=1e-5, atol=1e-6), (loss_small, ref_small)

    # Default dispatch: tiny batch takes the fused-XLA fallback.
    loss_fb = mse_loss(inf_small, gt_small)
    assert jnp.allclose(loss_fb, ref_small, rtol=1e-5, atol=1e-6), (loss_fb, ref_small)

    # Larger bf16 batch: multi-tile "parallel" grid, padding path, in-kernel upcast,
    # bf16 labels + bf16 selection matmul.
    B_big = 300000
    inf_big = jax.random.normal(k3, (B_big, NUM_CLASSES), dtype=jnp.bfloat16)
    gt_big = jax.random.randint(k4, (B_big,), 0, NUM_CLASSES, dtype=jnp.int32)
    loss_big = mse_loss(inf_big, gt_big)
    jax.block_until_ready(loss_big)
    ref_big = _mse_loss_xla(inf_big, gt_big)
    assert jnp.allclose(loss_big, ref_big, rtol=1e-3, atol=1e-3), (loss_big, ref_big)

    print("KERNEL_OK")
</pallas_src>

<mosaic_0001>
module attributes {stable_mosaic.version = 11 : i64} {
  func.func @_mse_loss_kernel(%arg0: i32, %arg1: memref<16x640xf32, #tpu.memory_space<vmem>>, %arg2: memref<16x64xbf16, #tpu.memory_space<vmem>>, %arg3: memref<64x640xbf16, #tpu.memory_space<vmem>>, %arg4: memref<1x640xf32, #tpu.memory_space<vmem>>) attributes {dimension_semantics = [#tpu.dimension_semantics<parallel>], iteration_bounds = array<i64: 1>, scalar_prefetch = 0 : i64, scratch_operands = 0 : i64, tpu.core_type = #tpu.core_type<tc>, window_params = [{transform_indices = @transform_0, window_bounds = array<i64: 16, 640>}, {transform_indices = @transform_1, window_bounds = array<i64: 16, 64>}, {pipeline_mode = #tpu.pipeline_mode<synchronous>, transform_indices = @transform_2, window_bounds = array<i64: 64, 640>}, {transform_indices = @transform_3, window_bounds = array<i64: 1, 640>}]} {
    %c0 = arith.constant 0 : index
    %c0_0 = arith.constant 0 : index
    %0 = vector.load %arg1[%c0, %c0_0] : memref<16x640xf32, #tpu.memory_space<vmem>>, vector<16x640xf32>
    %c0_1 = arith.constant 0 : index
    %c0_2 = arith.constant 0 : index
    %1 = vector.load %arg2[%c0_1, %c0_2] : memref<16x64xbf16, #tpu.memory_space<vmem>>, vector<16x64xbf16>
    %c0_3 = arith.constant 0 : index
    %c0_4 = arith.constant 0 : index
    %2 = vector.load %arg3[%c0_3, %c0_4] : memref<64x640xbf16, #tpu.memory_space<vmem>>, vector<64x640xbf16>
    %cst = arith.constant dense<0.000000e+00> : vector<16x640xf32>
    %3 = tpu.matmul %1, %2, %cst {dimension_numbers = #tpu.dot_dimension_numbers<[1], [0], [0], [1], [0, 0, 1, 1], [], []>} : vector<16x64xbf16>, vector<64x640xbf16>, vector<16x640xf32> -> vector<16x640xf32>
    %4 = tpu.iota {dimensions = array<i32: 1>} : vector<1x640xi32>
    %c10_i32 = arith.constant 10 : i32
    %c0_i32 = arith.constant 0 : i32
    %5 = arith.cmpi eq, %c10_i32, %c0_i32 : i32
    %c1_i32 = arith.constant 1 : i32
    %6 = arith.select %5, %c1_i32, %c10_i32 : i32
    %7 = vector.broadcast %6 : i32 to vector<1x640xi32>
    %8 = arith.remsi %4, %7 : vector<1x640xi32>
    %c0_i32_5 = arith.constant 0 : i32
    %9 = vector.broadcast %c0_i32_5 : i32 to vector<1x640xi32>
    %10 = arith.cmpi ne, %8, %9 : vector<1x640xi32>
    %c0_i32_6 = arith.constant 0 : i32
    %11 = vector.broadcast %c0_i32_6 : i32 to vector<1x640xi32>
    %12 = arith.cmpi slt, %8, %11 : vector<1x640xi32>
    %c0_i32_7 = arith.constant 0 : i32
    %13 = arith.cmpi slt, %6, %c0_i32_7 : i32
    %14 = vector.broadcast %13 : i1 to vector<1x640xi1>
    %15 = vector.broadcast %14 : vector<1x640xi1> to vector<1x640xi1>
    %16 = arith.xori %12, %15 : vector<1x640xi1>
    %17 = arith.andi %16, %10 : vector<1x640xi1>
    %18 = vector.broadcast %6 : i32 to vector<1x640xi32>
    %19 = arith.addi %8, %18 : vector<1x640xi32>
    %20 = arith.select %17, %19, %8 : vector<1x640xi1>, vector<1x640xi32>
    %21 = arith.sitofp %20 : vector<1x640xi32> to vector<1x640xf32>
    %22 = vector.broadcast %21 : vector<1x640xf32> to vector<16x640xf32>
    %23 = arith.cmpf oeq, %3, %22 : vector<16x640xf32>
    %24 = arith.extui %23 : vector<16x640xi1> to vector<16x640xi32>
    %25 = arith.sitofp %24 : vector<16x640xi32> to vector<16x640xf32>
    %26 = arith.subf %0, %25 : vector<16x640xf32>
    %27 = arith.mulf %26, %26 : vector<16x640xf32>
    %cst_8 = arith.constant dense<0.000000e+00> : vector<640xf32>
    %28 = vector.multi_reduction <add>, %27, %cst_8 [0] : vector<16x640xf32> to vector<640xf32>
    %29 = vector.shape_cast %28 : vector<640xf32> to vector<1x640xf32>
    %c0_9 = arith.constant 0 : index
    %c0_10 = arith.constant 0 : index
    %30 = vector.load %arg4[%c0_9, %c0_10] : memref<1x640xf32, #tpu.memory_space<vmem>>, vector<1x640xf32>
    tpu.vector_store %arg4[%c0_9, %c0_10], %29 {strides = array<i32>} : memref<1x640xf32, #tpu.memory_space<vmem>>, vector<1x640xf32>,
    return
  }
  func.func @transform_0(%arg0: i32) -> (i32, i32) {
    %c0_i32 = arith.constant 0 : i32
    %c0_i32_0 = arith.constant 0 : i32
    return %arg0, %c0_i32 : i32, i32
  }
  func.func @transform_1(%arg0: i32) -> (i32, i32) {
    %c0_i32 = arith.constant 0 : i32
    %c0_i32_0 = arith.constant 0 : i32
    return %arg0, %c0_i32 : i32, i32
  }
  func.func @transform_2(%arg0: i32) -> (i32, i32) {
    %c0_i32 = arith.constant 0 : i32
    %c0_i32_0 = arith.constant 0 : i32
    %c0_i32_1 = arith.constant 0 : i32
    return %c0_i32, %c0_i32_0 : i32, i32
  }
  func.func @transform_3(%arg0: i32) -> (i32, i32) {
    %c0_i32 = arith.constant 0 : i32
    %c0_i32_0 = arith.constant 0 : i32
    return %arg0, %c0_i32 : i32, i32
  }
}

</mosaic_0001>

<bundles_post_ra>
// kernel: mse_loss.1
= control target key start
LH: loop header
LB: loop body
LE: loop exit
PB: predicated region body
PF: predicated region fallthrough
CT: control target
= control target key end

     0   :  { %v615_v1 = vmov 0   ;;  %vm160_vm0 = vcmask 523264   ;;  %v616_v19 = vmov 0.0   ;;  %vm617_vm1 = vmmov 0   ;;  %s789_s2 = inlined_call_operand.vmem [shape: bf16[64,640], index: 2, kind: input, shape index: {}]   ;;  %s790_s1 = inlined_call_operand.vmem [shape: bf16[16,64], index: 1, kind: input, shape index: {}]   ;;  %s791_s0 = inlined_call_operand.vmem [shape: f32[16,640], index: 0, kind: input, shape index: {}]   ;;  %s792_s3 = inlined_call_operand.vmem [shape: f32[1,640], index: 3, kind: output, shape index: {}]  }
   0x1   :  { %v586_v0 = vld [vmem:[%s789_s2 + $0x4] ss:$20 sps:$4 sm:$0xff]   ;;  %196 = vmatprep.mubr.bf16.mxu0 %v615_v1  ;;  %239 = vmatprep.mubr.bf16.mxu1 %v615_v1  ;;  %v588_v2 = vld [vmem:[%s789_s2 + $0xc] ss:$20 sps:$4 sm:$0xff]   ;;  %v591_v4 = vld [vmem:[%s789_s2 + $0x8] ss:$20 sps:$4 sm:$0xff]   ;;  %v291_v23 = vlaneseq }
   0x2   :  { %164 = vmatprep.subr.bf16.mxu0 %v586_v0  ;;  %v590_v3 = vld [vmem:[%s789_s2] ss:$20 sps:$4 sm:$0xff]   ;;  %207 = vmatprep.subr.bf16.mxu1 %v588_v2  ;;  %v596_v7 = vld [vmem:[%s789_s2 + $0x28] ss:$20 sps:$4 sm:$0xff]   ;;  %v597_v8 = vld [vmem:[%s789_s2 + $0x30] ss:$20 sps:$4 sm:$0xff]  }
   0x3   :  { %v592_v5 = vld [vmem:[%s789_s2 + $0x2c] ss:$20 sps:$4 sm:$0xff]   ;;  %165 = vmatpush1.bf16.msra.mxu0 %v590_v3  ;;  %208 = vmatpush1.bf16.msra.mxu1 %v591_v4  ;;  %v594_v6 = vld [vmem:[%s789_s2 + $0x34] ss:$20 sps:$4 sm:$0xff]   ;;  %v600_v10 = vld [vmem:[%s789_s2 + $0x5c] ss:$20 sps:$4 sm:$0xff]  }
   0x4   :  { %166 = vmatprep.subr.bf16.mxu0 %v592_v5  ;;  %209 = vmatprep.subr.bf16.mxu1 %v594_v6  ;;  %v598_v9 = vld [vmem:[%s789_s2 + $0x54] ss:$20 sps:$4 sm:$0xff]   ;;  %v602_v11 = vld [vmem:[%s789_s2 + $0x50] ss:$20 sps:$4 sm:$0xff]   ;;  %v603_v12 = vld [vmem:[%s789_s2 + $0x58] ss:$20 sps:$4 sm:$0xff]  }
   0x5   :  { %v604_v13 = vld [vmem:[%s789_s2 + $0x7c] ss:$20 sps:$4 sm:$0xff]   ;;  %v606_v14 = vld [vmem:[%s789_s2 + $0x84] ss:$20 sps:$4 sm:$0xff]   ;;  %v609_v16 = vld [vmem:[%s789_s2 + $0x80] ss:$20 sps:$4 sm:$0xff]  }
   0x6   :  { %v608_v15 = vld [vmem:[%s789_s2 + $0x78] ss:$20 sps:$4 sm:$0xff]   ;;  %v610_v17 = vld [vmem:[%s790_s1] sm:$0xff]   ;;  %v614_v22 = vld [vmem:[%s789_s2 + $0x88] ss:$20 sps:$4 sm:$0xff]   ;;  %v292_v24 = vand.u32 127, %v291_v23 }
   0x7   :  { %167 = vmatpush1.bf16.msra.mxu0 %v596_v7  ;;  %210 = vmatpush1.bf16.msra.mxu1 %v597_v8  ;;  %v611_v18 = vld [vmem:[%s789_s2 + $0x10] ss:$20 sps:$4 sm:$0xff]   ;;  %v612_v20 = vld [vmem:[%s789_s2 + $0x38] ss:$20 sps:$4 sm:$0xff]   ;;  %v613_v21 = vld [vmem:[%s789_s2 + $0x60] ss:$20 sps:$4 sm:$0xff]  }
   0x8   :  { %168 = vmatprep.subr.bf16.mxu0 %v598_v9  ;;  %211 = vmatprep.subr.bf16.mxu1 %v600_v10  ;;  %v293_v25 = vadd.s32 128, %v292_v24  ;;  %v294_v26 = vadd.s32 256, %v292_v24  ;;  %v295_v27 = vadd.s32 384, %v292_v24  ;;  %v296_v42 = vadd.s32 512, %v292_v24  ;;  %v15_v3 = vld [vmem:[%s791_s0] sm:$0xff]  ;;  %v17_v5 = vld [vmem:[%s791_s0 + $0x10] sm:$0xff] }
   0x9   :  { %v711_v28 = vmul.u32.u64.low 3435973837, %v292_v24  ;;  %v712_v29 = vmul.u32.u64.high 3435973837, %v292_v24, %v711_v28 }
   0xa   :  { %v714_v30 = vmul.u32.u64.low 3435973837, %v293_v25  ;;  %v715_v31 = vmul.u32.u64.high 3435973837, %v293_v25, %v714_v30  ;;  %v717_v32 = vmul.u32.u64.low 3435973837, %v294_v26  ;;  %v718_v33 = vmul.u32.u64.high 3435973837, %v294_v26, %v717_v32 }
   0xb   :  { %169 = vmatpush1.bf16.msra.mxu0 %v602_v11  ;;  %212 = vmatpush1.bf16.msra.mxu1 %v603_v12  ;;  %v720_v34 = vmul.u32.u64.low 3435973837, %v295_v27  ;;  %v721_v35 = vmul.u32.u64.high 3435973837, %v295_v27, %v720_v34  ;;  %v303_v36 = vshrl.u32 %v712_v29, 3  ;;  %v18_v11 = vld [vmem:[%s791_s0 + $0x18] sm:$0xff] }
   0xc   :  { %170 = vmatprep.subr.bf16.mxu0 %v604_v13  ;;  %213 = vmatprep.subr.bf16.mxu1 %v606_v14  ;;  %v314_v37 = vshrl.u32 %v715_v31, 3  ;;  %v325_v38 = vshrl.u32 %v718_v33, 3  ;;  %v727_v47 = vmul.u32.u64.low 3435973837, %v296_v42  ;;  %v728_v48 = vmul.u32.u64.high 3435973837, %v296_v42, %v727_v47  ;;  %v21_v33 = vld [vmem:[%s791_s0 + $0x30] sm:$0xff]  ;;  %v23_v34 = vld [vmem:[%s791_s0 + $0x40] sm:$0xff] }
   0xd   :  { %v336_v39 = vshrl.u32 %v721_v35, 3  ;;  %v304_v40 = vmul.u32 10, %v303_v36 }
   0xe   :  { %v315_v41 = vmul.u32 10, %v314_v37  ;;  %v326_v43 = vmul.u32 10, %v325_v38  ;;  %v347_v56 = vshrl.u32 %v728_v48, 3 }
   0xf   :  { %171 = vmatpush1.bf16.msra.mxu0 %v608_v15  ;;  %214 = vmatpush1.bf16.msra.mxu1 %v609_v16  ;;  %v337_v44 = vmul.u32 10, %v336_v39  ;;  %v305_v45 = vsub.s32 %v292_v24, %v304_v40 }
  0x10   :  { %560 = vmatprep.subr.bf16.mxu0 %v616_v19  ;;  %v316_v46 = vsub.s32 %v293_v25, %v315_v41  ;;  %v327_v49 = vsub.s32 %v294_v26, %v326_v43  ;;  %v348_v61 = vmul.u32 10, %v347_v56 }
  0x11   :  { %v338_v50 = vsub.s32 %v295_v27, %v337_v44  ;;  %vm352_vm2 = vcmp.ne.s32.totalorder %v305_v45, 0  ;;  %vm357_vm3 = vcmp.lt.s32.totalorder %v305_v45, 0  ;;  %v367_v52 = vadd.s32 10, %v305_v45 }
  0x12   :  { %542 = vmatmul.mubr.msk.bf16.vlgmr.msra.gmra.mrb[0].mxu0 %vm160_vm0, %v610_v17  ;;  %543 = vmatmul.mubr.msk.bf16.vlgmr.msra.gmra.mrb[0].mxu1 %vm160_vm0, %v610_v17  ;;  %vm353_vm4 = vcmp.ne.s32.totalorder %v316_v46, 0  ;;  %vm358_vm5 = vcmp.lt.s32.totalorder %v316_v46, 0  ;;  %vm354_vm6 = vcmp.ne.s32.totalorder %v327_v49, 0  ;;  %vm359_vm7 = vcmp.lt.s32.totalorder %v327_v49, 0  ;;  %vm730_vm8 = vmand %vm357_vm3, %vm352_vm2 }
  0x13   :  { %561 = vmatpush3.bf16.msra.mxu0 %v611_v18  ;;  %568 = vmatprep.mubr.msk.bf16.mxu0 %vm617_vm1, %v616_v19  ;;  %vm355_vm9 = vcmp.ne.s32.totalorder %v338_v50, 0  ;;  %vm360_vm10 = vcmp.lt.s32.totalorder %v338_v50, 0  ;;  %v369_v53 = vadd.s32 10, %v327_v49  ;;  %vm363_vm11 = vmand %vm358_vm5, %vm353_vm4  ;;  %v368_v54 = vadd.s32 10, %v316_v46  ;;  %v22_v18 = vld [vmem:[%s791_s0 + $0x38] sm:$0xff] }
  0x14   :  { %562 = vmatprep.subr.bf16.mxu0 %v616_v19  ;;  %vm364_vm12 = vmand %vm359_vm7, %vm354_vm6  ;;  %v370_v55 = vadd.s32 10, %v338_v50  ;;  %v372_v57 = vsel %vm730_vm8, %v367_v52, %v305_v45  ;;  %v349_v2 = vsub.s32 %v296_v42, %v348_v61  ;;  %v618_v61 = vmov 1966171168  }
  0x15   :  { %vm365_vm13 = vmand %vm360_vm10, %vm355_vm9  ;;  %v374_v58 = vsel %vm364_vm12, %v369_v53, %v327_v49  ;;  %v373_v59 = vsel %vm363_vm11, %v368_v54, %v316_v46  ;;  %v377_v62 = vcvt.s32.f32 %v372_v57  ;;  %vm514_vm11 = vcmp.lt.s32.totalorder %v291_v23, 640 }
  0x16   :  { %v375_v60 = vsel %vm365_vm13, %v370_v55, %v338_v50  ;;  %v379_v63 = vcvt.s32.f32 %v374_v58  ;;  %v378_v0 = vcvt.s32.f32 %v373_v59  ;;  %vm356_vm2 = vcmp.ne.s32.totalorder %v349_v2, 0 }
  0x17   :  { %563 = vmatpush3.bf16.msra.mxu0 %v612_v20  ;;  %v380_v1 = vcvt.s32.f32 %v375_v60  ;;  %vm361_vm5 = vcmp.lt.s32.totalorder %v349_v2, 0  ;;  %v371_v28 = vadd.s32 10, %v349_v2 }
  0x18   :  { %564 = vmatprep.subr.bf16.mxu0 %v616_v19  ;;  %vm768_vm8 = vmand %vm361_vm5, %vm356_vm2 }
  0x19   :  { %v376_v46 = vsel %vm768_vm8, %v371_v28, %v349_v2 }
  0x1a   :  { %v381_v54 = vcvt.s32.f32 %v376_v46 }
  0x1b   :  { %565 = vmatpush3.bf16.msra.mxu0 %v613_v21 }
  0x1c   :  { %566 = vmatprep.subr.bf16.mxu0 %v616_v19 }
  0x1f   :  { %567 = vmatpush3.bf16.msra.mxu0 %v614_v22  ;;  %v16_v22 = vld [vmem:[%s791_s0 + $0x8] sm:$0xff] }
  0x22   :  { %569 = vmatmul.mubr.msk.bf16.vlgmr.msra.gmra.mrb[4].mxu0 %vm160_vm0, %v610_v17  ;;  %v20_v17 = vld [vmem:[%s791_s0 + $0x28] sm:$0xff] }
  0xe5   :  { %v198_v4 = vpop.f32.mrb[0].mxu0  ;;  %v241_v6 = vpop.f32.mrb[0].mxu1 }
  0xe6   :  { %vm382_vm14 = vcmp.eq.f32.partialorder %v198_v4, %v377_v62  ;;  %vm384_vm15 = vcmp.eq.f32.partialorder %v241_v6, %v379_v63  ;;  %v200_v7 = vpop.f32.mrb[1].mxu0  ;;  %v243_v8 = vpop.f32.mrb[1].mxu1 }
  0xe7   :  { %v545_v9 = vsel %vm382_vm14, 1.0, %v616_v19  ;;  %v547_v10 = vsel %vm384_vm15, 1.0, %v616_v19  ;;  %vm383_vm0 = vcmp.eq.f32.partialorder %v200_v7, %v378_v0  ;;  %vm385_vm1 = vcmp.eq.f32.partialorder %v243_v8, %v380_v1  ;;  %v202_v12 = vpop.f32.mrb[2].mxu0  ;;  %v245_v13 = vpop.f32.mrb[2].mxu1  ;;  %v24_v7 = vld [vmem:[%s791_s0 + $0x48] sm:$0xff] }
  0xe8   :  { %v412_v14 = vsub.f32 %v15_v3, %v545_v9  ;;  %v414_v15 = vsub.f32 %v17_v5, %v547_v10  ;;  %v548_v16 = vsel %vm385_vm1, 1.0, %v616_v19  ;;  %v204_v20 = vpop.f32.mrb[3].mxu0  ;;  %v247_v21 = vpop.f32.mrb[3].mxu1  ;;  %v546_v24 = vsel %vm383_vm0, 1.0, %v616_v19 }
  0xe9   :  { %vm387_vm3 = vcmp.eq.f32.partialorder %v202_v12, %v377_v62  ;;  %vm389_vm4 = vcmp.eq.f32.partialorder %v245_v13, %v379_v63  ;;  %v415_v25 = vsub.f32 %v18_v11, %v548_v16  ;;  %v413_v35 = vsub.f32 %v16_v22, %v546_v24  ;;  %v19_v63 = vld [vmem:[%s791_s0 + $0x20] sm:$0xff] }
  0xea   :  { %v550_v26 = vsel %vm387_vm3, 1.0, %v616_v19  ;;  %v552_v27 = vsel %vm389_vm4, 1.0, %v616_v19  ;;  %v422_v29 = vmul.f32 %v412_v14, %v412_v14  ;;  %v424_v30 = vmul.f32 %v414_v15, %v414_v15 }
  0xeb   :  { %v417_v31 = vsub.f32 %v20_v17, %v550_v26  ;;  %v419_v32 = vsub.f32 %v22_v18, %v552_v27  ;;  %vm388_vm6 = vcmp.eq.f32.partialorder %v204_v20, %v378_v0  ;;  %vm390_vm7 = vcmp.eq.f32.partialorder %v247_v21, %v380_v1 }
  0xec   :  { %v551_v39 = vsel %vm388_vm6, 1.0, %v616_v19  ;;  %v553_v40 = vsel %vm390_vm7, 1.0, %v616_v19  ;;  %v425_v41 = vmul.f32 %v415_v25, %v415_v25  ;;  %v423_v47 = vmul.f32 %v413_v35, %v413_v35 }
  0xed   :  { %v427_v37 = vmul.f32 %v417_v31, %v417_v31  ;;  %v429_v38 = vmul.f32 %v419_v32, %v419_v32  ;;  %v418_v42 = vsub.f32 %v21_v33, %v551_v39  ;;  %v420_v43 = vsub.f32 %v23_v34, %v553_v40 }
  0xee   :  { %v475_v62 = vunpack.c.l.s4 %v618_v61  ;;  %v478_v18 = vshrl.u32 %v291_v23, 7 }
  0xef   :  { %v432_v44 = vadd.f32 %v427_v37, %v422_v29  ;;  %v446_v45 = vadd.f32 %v429_v38, %v424_v30  ;;  %v428_v48 = vmul.f32 %v418_v42, %v418_v42  ;;  %v430_v49 = vmul.f32 %v420_v43, %v420_v43 }
  0xf0   :  { %v476_v15 = vunpack.c.0.s8 %v475_v62 }
  0xf1   :  { %v433_v50 = vrot.slane %v432_v44, 4  ;;  %v447_v51 = vrot.slane %v446_v45, 4  ;;  %v439_v52 = vadd.f32 %v428_v48, %v423_v47  ;;  %v453_v53 = vadd.f32 %v430_v49, %v425_v41 }
  0xf2   :  { %v479_v30 = vsub.s32 %v476_v15, %v478_v18 }
  0xf3   :  { %v434_v55 = vadd.f32 %v433_v50, %v432_v44  ;;  %v448_v56 = vadd.f32 %v447_v51, %v446_v45  ;;  %v440_v57 = vrot.slane %v439_v52, 4  ;;  %v454_v58 = vrot.slane %v453_v53, 4 }
  0xf5   :  { %v435_v59 = vrot.slane %v434_v55, 2  ;;  %v449_v60 = vrot.slane %v448_v56, 2  ;;  %v284_v0 = vpop.f32.mrb[4].mxu0  ;;  %v441_v1 = vadd.f32 %v440_v57, %v439_v52  ;;  %v455_v2 = vadd.f32 %v454_v58, %v453_v53 }
  0xf6   :  { %vm386_vm9 = vcmp.eq.f32.partialorder %v284_v0, %v381_v54  ;;  %v570_v3 = vpop.f32.mrb[5].mxu0 }
  0xf7   :  { %v436_v4 = vadd.f32 %v435_v59, %v434_v55  ;;  %v450_v5 = vadd.f32 %v449_v60, %v448_v56  ;;  %v549_v6 = vsel %vm386_vm9, 1.0, %v616_v19  ;;  %v287_v8 = vpop.f32.mrb[6].mxu0  ;;  %v442_v9 = vrot.slane %v441_v1, 2 }
  0xf8   :  { %v456_v10 = vrot.slane %v455_v2, 2  ;;  %v416_v11 = vsub.f32 %v19_v63, %v549_v6  ;;  %vm391_vm10 = vcmp.eq.f32.partialorder %v287_v8, %v381_v54  ;;  %v571_v12 = vpop.f32.mrb[7].mxu0 }
  0xf9   :  { %v437_v13 = vrot.slane %v436_v4, 1  ;;  %v451_v14 = vrot.slane %v450_v5, 1  ;;  %v554_v16 = vsel %vm391_vm10, 1.0, %v616_v19  ;;  %v443_v17 = vadd.f32 %v442_v9, %v441_v1 }
  0xfa   :  { %v457_v20 = vadd.f32 %v456_v10, %v455_v2  ;;  %v421_v21 = vsub.f32 %v24_v7, %v554_v16  ;;  %v426_v24 = vmul.f32 %v416_v11, %v416_v11 }
  0xfb   :  { %v438_v22 = vadd.f32 %v437_v13, %v436_v4  ;;  %v452_v25 = vadd.f32 %v451_v14, %v450_v5  ;;  %v444_v26 = vrot.slane %v443_v17, 1 }
  0xfc   :  { %v458_v27 = vrot.slane %v457_v20, 1  ;;  %v431_v28 = vmul.f32 %v421_v21, %v421_v21 }
  0xfd   :  { %v445_v29 = vadd.f32 %v444_v26, %v443_v17 }
  0xfe   :  { %v459_v31 = vadd.f32 %v458_v27, %v457_v20  ;;  %v460_v32 = vadd.f32 %v431_v28, %v426_v24 }
  0xff   :  { %v472_v33 = vcombine.low %v438_v22, %v445_v29 }
 0x100   :  { %v473_v34 = vcombine.low %v452_v25, %v459_v31  ;;  %v461_v35 = vrot.slane %v460_v32, 4 }
 0x101   :  { %v480_v36 = vrot.slane %v472_v33, %v479_v30 }
 0x102   :  { %v487_v19 = vrot.slane %v473_v34, %v479_v30  ;;  %v462_v37 = vadd.f32 %v461_v35, %v460_v32 }
 0x104   :  { %v495_v38 = vcombine.low %v480_v36, %v487_v19  ;;  %v463_v39 = vrot.slane %v462_v37, 2 }
 0x106   :  { %v464_v40 = vadd.f32 %v463_v39, %v462_v37  ;;  %v502_v44 = vrot.slane %v495_v38, %v479_v30 }
 0x108   :  { %v465_v41 = vrot.slane %v464_v40, 1 }
 0x10a   :  { %v466_v42 = vadd.f32 %v465_v41, %v464_v40 }
 0x10c   :  { %v494_v43 = vrot.slane %v466_v42, %v479_v30 }
 0x10e   :  { %v509_v45 = vrot.slane %v494_v43, %v479_v30 }
 0x110   :  { %v510_v46 = vcombine.low %v502_v44, %v509_v45 }
 0x112   :  { %516 = vst.msk [vmem:[%s792_s3] sm:$0x1f] %vm514_vm11, %v510_v46 }

</bundles_post_ra>
